<compile_context>
chip_gen: v6e
topology: v6e:2x2x1
jax: 0.10.0
libtpu: 0.0.40
codegen_flags: <defaults>
</compile_context>

<pallas_src>
import math

import jax
import jax.numpy as jnp
from jax.experimental import pallas as pl
from jax.experimental.pallas import tpu as pltpu


def make_pe_table(word_size: int, max_length: int) -> jnp.ndarray:
    """Deterministic positional-encoding table, identical to the PyTorch __init__."""
    pos = jnp.arange(max_length, dtype=jnp.float32)[:, None]            # (L, 1)
    words = jnp.arange(word_size, dtype=jnp.float32)                     # (D,)
    mod2 = words % 2.0
    offset = jnp.pi * 0.5 * mod2
    x = pos * jnp.exp(-math.log(10000.0) * (words - mod2) / word_size)   # (L, D)
    return jnp.sin(x + offset)                                            # (L, D)


def _pe_add_kernel(x_ref, pe_ref, o_ref):
    # x_ref / pe_ref / o_ref : (tile_s, B*D) VMEM tiles.
    # Pure streaming add; last dim is the full fused batch*word axis, so the
    # store is an unmasked full-width vst (lane-dense).
    o_ref[...] = x_ref[...] + pe_ref[...]


def _round_up(x: int, m: int) -> int:
    return ((x + m - 1) // m) * m


def positional_encoding_forward(
    ins: jnp.ndarray,
    vecs: jnp.ndarray,
    *,
    target_tile_bytes: int = 4 * 1024 * 1024,
    vmem_limit_bytes: int = 32 * 1024 * 1024,
) -> jnp.ndarray:
    """ins: (S, B, D), vecs: (max_length, D) with max_length >= S."""
    S, B, D = ins.shape
    assert vecs.shape[0] >= S and vecs.shape[1] == D
    BD = B * D
    row_bytes = BD * jnp.dtype(ins.dtype).itemsize

    # ---- VMEM-budget-driven sequence tile (multiple of 8 sublanes) ---------
    # 3 streams (x in, pe in, out) double-buffered => ~6 * tile_bytes of VMEM.
    # target_tile_bytes = 4 MiB keeps that ~24 MiB, comfortably under the
    # 32 MiB scoped limit we request (fits v7x's smaller VMEM too).
    s_pad8 = _round_up(S, 8)
    tile_s = max(8, min(s_pad8, (target_tile_bytes // max(row_bytes, 1)) // 8 * 8))
    # Guarantee >= 2 blocks along the 'parallel' axis when there is enough
    # sequence to split (v7x megacore: both TensorCores get work).
    if s_pad8 >= 16:
        tile_s = min(tile_s, _round_up(pl.cdiv(s_pad8, 2), 8))
    s_pad = _round_up(S, tile_s)
    grid = (s_pad // tile_s,)

    # ---- lane-dense layout --------------------------------------------------
    x2 = ins.reshape(S, BD)                   # free reshape (row-major)
    pe = jnp.tile(vecs[:S], (1, B))           # (S, B*D): PE broadcast over batch
    if s_pad != S:                            # ragged S: pad instead of one huge block
        x2 = jnp.pad(x2, ((0, s_pad - S), (0, 0)))
        pe = jnp.pad(pe, ((0, s_pad - S), (0, 0)))

    # NOTE: out = x2 + pe could also alias x2 via input_output_aliases={0: 0}
    # when the caller donates the activation buffer; left off here for safety.
    out2 = pl.pallas_call(
        _pe_add_kernel,
        out_shape=jax.ShapeDtypeStruct((s_pad, BD), ins.dtype),
        grid_spec=pltpu.PrefetchScalarGridSpec(
            num_scalar_prefetch=0,
            grid=grid,
            in_specs=[
                pl.BlockSpec((tile_s, BD), lambda i: (i, 0)),
                pl.BlockSpec((tile_s, BD), lambda i: (i, 0)),
            ],
            out_specs=pl.BlockSpec((tile_s, BD), lambda i: (i, 0)),
        ),
        compiler_params=pltpu.CompilerParams(
            dimension_semantics=("parallel",),
            vmem_limit_bytes=vmem_limit_bytes,
        ),
    )(x2, pe)

    return out2[:S].reshape(S, B, D)


if __name__ == "__main__":
    word_size = 32    # D
    max_length = 16   # L
    seq = 8           # S (<= max_length)
    batch = 2         # B

    key = jax.random.PRNGKey(0)
    x = jax.random.normal(key, (seq, batch, word_size), dtype=jnp.float32)

    vecs = make_pe_table(word_size, max_length)   # deterministic "parameter"
    out = jax.block_until_ready(positional_encoding_forward(x, vecs))

    # sanity check against a pure-JAX reference of the same formula
    ref = x + vecs[:seq][:, None, :]
    assert out.shape == x.shape
    assert jnp.allclose(out, ref, atol=1e-6), "mismatch vs reference"

    print("KERNEL_OK")
</pallas_src>

<mosaic_0001>
module attributes {stable_mosaic.version = 11 : i64} {
  func.func @_pe_add_kernel(%arg0: i32, %arg1: memref<8x64xf32, #tpu.memory_space<vmem>>, %arg2: memref<8x64xf32, #tpu.memory_space<vmem>>, %arg3: memref<8x64xf32, #tpu.memory_space<vmem>>) attributes {dimension_semantics = [#tpu.dimension_semantics<parallel>], iteration_bounds = array<i64: 1>, scalar_prefetch = 0 : i64, scratch_operands = 0 : i64, tpu.core_type = #tpu.core_type<tc>, window_params = [{transform_indices = @transform_0, window_bounds = array<i64: 8, 64>}, {transform_indices = @transform_1, window_bounds = array<i64: 8, 64>}, {transform_indices = @transform_2, window_bounds = array<i64: 8, 64>}]} {
    %c0 = arith.constant 0 : index
    %c0_0 = arith.constant 0 : index
    %0 = vector.load %arg1[%c0, %c0_0] : memref<8x64xf32, #tpu.memory_space<vmem>>, vector<8x64xf32>
    %c0_1 = arith.constant 0 : index
    %c0_2 = arith.constant 0 : index
    %1 = vector.load %arg2[%c0_1, %c0_2] : memref<8x64xf32, #tpu.memory_space<vmem>>, vector<8x64xf32>
    %2 = arith.addf %0, %1 : vector<8x64xf32>
    %c0_3 = arith.constant 0 : index
    %c0_4 = arith.constant 0 : index
    %3 = vector.load %arg3[%c0_3, %c0_4] : memref<8x64xf32, #tpu.memory_space<vmem>>, vector<8x64xf32>
    tpu.vector_store %arg3[%c0_3, %c0_4], %2 {strides = array<i32>} : memref<8x64xf32, #tpu.memory_space<vmem>>, vector<8x64xf32>,
    return
  }
  func.func @transform_0(%arg0: i32) -> (i32, i32) {
    %c0_i32 = arith.constant 0 : i32
    %c0_i32_0 = arith.constant 0 : i32
    return %arg0, %c0_i32 : i32, i32
  }
  func.func @transform_1(%arg0: i32) -> (i32, i32) {
    %c0_i32 = arith.constant 0 : i32
    %c0_i32_0 = arith.constant 0 : i32
    return %arg0, %c0_i32 : i32, i32
  }
  func.func @transform_2(%arg0: i32) -> (i32, i32) {
    %c0_i32 = arith.constant 0 : i32
    %c0_i32_0 = arith.constant 0 : i32
    return %arg0, %c0_i32 : i32, i32
  }
}

</mosaic_0001>

<bundles_post_ra>
// kernel: tpu_custom_call.1
= control target key start
LH: loop header
LB: loop body
LE: loop exit
PB: predicated region body
PF: predicated region fallthrough
CT: control target
= control target key end

     0   :  { %7 = vsyncpa [#allocation3], 0  ;;  %s153_s0 = inlined_call_operand.hbm [shape: f32[8,64], index: 0, kind: input, shape index: {}]   ;;  %s154_s1 = inlined_call_operand.hbm [shape: f32[8,64], index: 1, kind: input, shape index: {}]   ;;  %s155_s2 = inlined_call_operand.hbm [shape: f32[8,64], index: 2, kind: output, shape index: {}]  }
   0x1   :  { %8 = vsyncpa [#allocation6], 0 }
   0x2   :  { %9 = vsyncpa [#allocation4], 0  ;;  %s126_s9 = smov [#allocation2]   ;;  %s127_s11 = smov [#allocation5]  }
   0x3   :  { %s16_s10 = sshll.u32 %s126_s9, 4  ;;  %s26_s12 = sshll.u32 %s127_s11, 4  ;;  %s17_s10 = int_to_ptr.vmem [resolvable:$true] %s16_s10  ;;  %s27_s12 = int_to_ptr.vmem [resolvable:$true] %s26_s12 }
   0x4   :  { %s68_s13 = scalar_lea.vmem %s17_s10, 128  ;;  %p73_p1 = scmp.lt.s32.totalorder %s17_s10, %s17_s10 }
   0x5   :  { %p69_p0 = scmp.ne.s32.totalorder %s17_s10, %s68_s13  ;;  %p74_p2 = scmp.lt.s32.totalorder %s68_s13, %s68_s13 }
   0x7   :  { %p75_p3 = por %p74_p2, %p73_p1 }
   0x9   :  { %p76_p4 = pnand %p75_p3, %p69_p0 }
   0xb   :  { %79 = shalt.err (!%p76_p4)
}
   0xc   :  { %19 = dma.hbm_to_vmem [thread:$0]  %s153_s0, 128, %s17_s10, [#allocation3]  }
   0xd   :  { %s88_s16 = scalar_lea.vmem %s27_s12, 128  ;;  %p93_p6 = scmp.lt.s32.totalorder %s27_s12, %s27_s12 }
   0xe   :  { %p89_p5 = scmp.ne.s32.totalorder %s27_s12, %s88_s16  ;;  %p94_p7 = scmp.lt.s32.totalorder %s88_s16, %s88_s16 }
  0x10   :  { %p95_p8 = por %p94_p7, %p93_p6 }
  0x12   :  { %p96_p9 = pnand %p95_p8, %p89_p5 }
  0x14   :  { %99 = shalt.err (!%p96_p9)
}
  0x15   :  { %29 = dma.hbm_to_vmem [thread:$0]  %s154_s1, 128, %s27_s12, [#allocation6]  }
  0x16   :  { %120 = dma.done.wait [#allocation3], 128  }
  0x17   :  { %121 = vsyncadd [#allocation3], 4294967168 }
  0x18   :  { %122 = dma.done.wait [#allocation6], 128  }
  0x19   :  { %123 = vsyncadd [#allocation6], 4294967168  ;;  %s128_s19 = smov [#allocation7]   ;;  %v36_v0 = vld [vmem:[#allocation2] sm:$0xff]  ;;  %v37_v1 = vld [vmem:[#allocation5] sm:$0xff]  ;;  %vm39_vm0 = vcmask 523264  }
  0x1a   :  { %s47_s20 = sshll.u32 %s128_s19, 4  ;;  %v38_v2 = vadd.f32 %v37_v1, %v36_v0  ;;  %s48_s20 = int_to_ptr.vmem [resolvable:$true] %s47_s20 }
  0x1b   :  { %s100_s0 = scalar_lea.vmem %s48_s20, 128  ;;  %p105_p11 = scmp.lt.s32.totalorder %s48_s20, %s48_s20 }
  0x1c   :  { %40 = vst.msk [vmem:[#allocation7] sm:$0xff] %vm39_vm0, %v38_v2  ;;  %p101_p10 = scmp.ne.s32.totalorder %s48_s20, %s100_s0  ;;  %p106_p12 = scmp.lt.s32.totalorder %s100_s0, %s100_s0 }
  0x1e   :  { %p107_p13 = por %p106_p12, %p105_p11 }
  0x20   :  { %p108_p0 = pnand %p107_p13, %p101_p10 }
  0x22   :  { %111 = shalt.err (!%p108_p0)
}
  0x23   :  { %50 = dma.vmem_to_hbm [thread:$0]  %s48_s20, 128, %s155_s2, [#allocation4]  }
  0x24   :  { %124 = dma.done.wait [#allocation4], 128  }
  0x25   :  { %125 = vsyncadd [#allocation4], 4294967168 }
  0x26   :  { %54 = vsyncpa [#allocation3], 1 }
  0x27   :  { %55 = vsyncpa [#allocation6], 1 }
  0x28   :  { %56 = vsyncpa [#allocation4], 1 }

</bundles_post_ra>
